<compile_context>
chip_gen: v7x
topology: tpu7x:2x2x1
jax: 0.10.0
libtpu: 0.0.40
codegen_flags: <defaults>
</compile_context>

<pallas_src>
import functools

import jax
import jax.numpy as jnp
from jax import lax
from jax.experimental import pallas as pl
from jax.experimental.pallas import tpu as pltpu


_LANE = 128          # vreg lane width
_ROW_TILE_MAX = 256  # max rows (sublane dim) per block
_L_TILE_MAX = 2048   # max lanes per block along seq_len


def _round_up(a, m):
    return ((a + m - 1) // m) * m


def _global_max_pool1d_kernel(x_ref, o_ref, acc_ref, *, seq_len, l_tile, fill):
    # x_ref:   (ROW_TILE, L_TILE) tile of the flattened (B*C, L) input
    # o_ref:   (ROW_TILE, 1) output block, resident across the L grid axis
    # acc_ref: (ROW_TILE, L_TILE) running elementwise max (VPU only)
    l = pl.program_id(1)

    @pl.when(l == 0)
    def _init():
        acc_ref[...] = jnp.full(acc_ref.shape, fill, acc_ref.dtype)

    tile = x_ref[...]
    if seq_len % l_tile != 0:
        # Mask the overhang of the last (possibly only) L tile with the
        # max-identity so padding never corrupts the result.
        lane = lax.broadcasted_iota(jnp.int32, tile.shape, 1)
        tile = jnp.where(l * l_tile + lane < seq_len, tile, fill)

    acc_ref[...] = jnp.maximum(acc_ref[...], tile)

    @pl.when(l == pl.num_programs(1) - 1)
    def _finish():
        # Single cross-lane reduce per row tile; write-back happens once per
        # row tile, so the narrow output store is off the bandwidth path.
        o_ref[...] = jnp.max(acc_ref[...], axis=-1, keepdims=True)


@jax.jit
def global_max_pool1d(x):
    """Global max pooling over the temporal (last) axis.

    Args:
      x: (B, C, L) array (same layout as PyTorch NCL).
    Returns:
      (B, C, 1) array, same dtype as x. Matches F.max_pool1d(x, kernel_size=L).
    """
    B, C, L = x.shape
    dtype = x.dtype
    rows = B * C

    if jnp.issubdtype(dtype, jnp.floating):
        fill = float("-inf")
    else:
        fill = int(jnp.iinfo(dtype).min)

    # Sublane granularity: 8 for 4-byte, 16 for 2-byte, 32 for 1-byte dtypes.
    sublane = {4: 8, 2: 16, 1: 32}.get(jnp.dtype(dtype).itemsize, 8)

    row_tile = min(_ROW_TILE_MAX, _round_up(rows, sublane))
    # Prefer >=2 row tiles so both v7x TensorCores get work, when rows allow.
    if rows > 2 * sublane and pl.cdiv(rows, row_tile) < 2:
        row_tile = _round_up(pl.cdiv(rows, 2), sublane)

    l_tile = min(_L_TILE_MAX, _round_up(L, _LANE))

    num_row_tiles = pl.cdiv(rows, row_tile)
    num_l_tiles = pl.cdiv(L, l_tile)

    x2d = x.reshape(rows, L)  # contiguous view, no copy

    kernel = functools.partial(
        _global_max_pool1d_kernel, seq_len=L, l_tile=l_tile, fill=fill)

    out = pl.pallas_call(
        kernel,
        out_shape=jax.ShapeDtypeStruct((num_row_tiles * row_tile, 1), dtype),
        grid_spec=pltpu.PrefetchScalarGridSpec(
            num_scalar_prefetch=0,
            grid=(num_row_tiles, num_l_tiles),
            in_specs=[pl.BlockSpec((row_tile, l_tile), lambda r, l: (r, l))],
            out_specs=pl.BlockSpec((row_tile, 1), lambda r, l: (r, 0)),
            scratch_shapes=[pltpu.VMEM((row_tile, l_tile), dtype)],
        ),
        compiler_params=pltpu.CompilerParams(
            dimension_semantics=("parallel", "arbitrary"),
        ),
    )(x2d)

    return out[:rows].reshape(B, C, 1)


if __name__ == "__main__":
    key = jax.random.PRNGKey(0)
    B, C, L = 2, 4, 16
    x = jax.random.normal(key, (B, C, L), dtype=jnp.float32)

    out = global_max_pool1d(x)
    out = jax.block_until_ready(out)

    # Reference (equivalent to F.max_pool1d(x, kernel_size=L))
    ref = jnp.max(x, axis=2, keepdims=True)
    assert out.shape == (B, C, 1), out.shape
    assert jnp.allclose(out, ref), "mismatch vs reference"

    print("KERNEL_OK")
</pallas_src>

<mosaic_0001>
module attributes {stable_mosaic.version = 11 : i64} {
  func.func @_global_max_pool1d_kernel(%arg0: i32, %arg1: i32, %arg2: memref<8x128xf32, #tpu.memory_space<vmem>>, %arg3: memref<8x1xf32, #tpu.memory_space<vmem>>, %arg4: memref<8x128xf32, #tpu.memory_space<vmem>>) attributes {dimension_semantics = [#tpu.dimension_semantics<parallel>, #tpu.dimension_semantics<arbitrary>], iteration_bounds = array<i64: 1, 1>, scalar_prefetch = 0 : i64, scratch_operands = 1 : i64, tpu.core_type = #tpu.core_type<tc>, window_params = [{transform_indices = @transform_0, window_bounds = array<i64: 8, 128>}, {transform_indices = @transform_1, window_bounds = array<i64: 8, 1>}]} {
    %c0_i32 = arith.constant 0 : i32
    %0 = arith.cmpi eq, %arg1, %c0_i32 : i32
    %1 = arith.extui %0 : i1 to i32
    %c0_i32_0 = arith.constant 0 : i32
    %2 = arith.cmpi ne, %1, %c0_i32_0 : i32
    scf.if %2 {
      %cst_8 = arith.constant 0xFF800000 : f32
      %18 = vector.broadcast %cst_8 : f32 to vector<8x128xf32>
      %c0_9 = arith.constant 0 : index
      %c0_10 = arith.constant 0 : index
      %19 = vector.load %arg4[%c0_9, %c0_10] : memref<8x128xf32, #tpu.memory_space<vmem>>, vector<8x128xf32>
      tpu.vector_store %arg4[%c0_9, %c0_10], %18 {strides = array<i32>} : memref<8x128xf32, #tpu.memory_space<vmem>>, vector<8x128xf32>,
    } else {
    }
    %c0 = arith.constant 0 : index
    %c0_1 = arith.constant 0 : index
    %3 = vector.load %arg2[%c0, %c0_1] : memref<8x128xf32, #tpu.memory_space<vmem>>, vector<8x128xf32>
    %4 = tpu.iota {dimensions = array<i32: 1>} : vector<8x128xi32>
    %c128_i32 = arith.constant 128 : i32
    %5 = arith.muli %arg1, %c128_i32 : i32
    %6 = vector.broadcast %5 : i32 to vector<8x128xi32>
    %7 = arith.addi %6, %4 : vector<8x128xi32>
    %c16_i32 = arith.constant 16 : i32
    %8 = vector.broadcast %c16_i32 : i32 to vector<8x128xi32>
    %9 = arith.cmpi slt, %7, %8 : vector<8x128xi32>
    %cst = arith.constant 0xFF800000 : f32
    %10 = vector.broadcast %cst : f32 to vector<8x128xf32>
    %11 = arith.select %9, %3, %10 : vector<8x128xi1>, vector<8x128xf32>
    %c0_2 = arith.constant 0 : index
    %c0_3 = arith.constant 0 : index
    %12 = vector.load %arg4[%c0_2, %c0_3] : memref<8x128xf32, #tpu.memory_space<vmem>>, vector<8x128xf32>
    %13 = arith.maximumf %12, %11 : vector<8x128xf32>
    %c0_4 = arith.constant 0 : index
    %c0_5 = arith.constant 0 : index
    %14 = vector.load %arg4[%c0_4, %c0_5] : memref<8x128xf32, #tpu.memory_space<vmem>>, vector<8x128xf32>
    tpu.vector_store %arg4[%c0_4, %c0_5], %13 {strides = array<i32>} : memref<8x128xf32, #tpu.memory_space<vmem>>, vector<8x128xf32>,
    %c0_i32_6 = arith.constant 0 : i32
    %15 = arith.cmpi eq, %arg1, %c0_i32_6 : i32
    %16 = arith.extui %15 : i1 to i32
    %c0_i32_7 = arith.constant 0 : i32
    %17 = arith.cmpi ne, %16, %c0_i32_7 : i32
    scf.if %17 {
      %c0_8 = arith.constant 0 : index
      %c0_9 = arith.constant 0 : index
      %18 = vector.load %arg4[%c0_8, %c0_9] : memref<8x128xf32, #tpu.memory_space<vmem>>, vector<8x128xf32>
      %cst_10 = arith.constant dense<0xFF800000> : vector<8xf32>
      %19 = vector.multi_reduction <maximumf>, %18, %cst_10 [1] : vector<8x128xf32> to vector<8xf32>
      %20 = vector.shape_cast %19 : vector<8xf32> to vector<8x1xf32>
      %c0_11 = arith.constant 0 : index
      %c0_12 = arith.constant 0 : index
      %21 = vector.load %arg3[%c0_11, %c0_12] : memref<8x1xf32, #tpu.memory_space<vmem>>, vector<8x1xf32>
      tpu.vector_store %arg3[%c0_11, %c0_12], %20 {strides = array<i32>} : memref<8x1xf32, #tpu.memory_space<vmem>>, vector<8x1xf32>,
    } else {
    }
    return
  }
  func.func @transform_0(%arg0: i32, %arg1: i32) -> (i32, i32) {
    %c0_i32 = arith.constant 0 : i32
    return %arg0, %arg1 : i32, i32
  }
  func.func @transform_1(%arg0: i32, %arg1: i32) -> (i32, i32) {
    %c0_i32 = arith.constant 0 : i32
    %c0_i32_0 = arith.constant 0 : i32
    return %arg0, %c0_i32 : i32, i32
  }
}

</mosaic_0001>

<bundles_post_ra>
// kernel: global_max_pool1d.1
= control target key start
LH: loop header
LB: loop body
LE: loop exit
PB: predicated region body
PF: predicated region fallthrough
CT: control target
= control target key end

     0   :  { %6 = vsyncpa [#allocation4], 0  ;;  %s74_s6 = smov [#allocation3]   ;;  %s100_s0 = inlined_call_operand.hbm [shape: f32[8,16], index: 0, kind: input, shape index: {}]   ;;  %s101_s1 = inlined_call_operand.vmem [shape: f32[8,1], index: 1, kind: output, shape index: {}]  }
   0x1   :  { %s13_s7 = sshll.u32 %s74_s6, 4  ;;  %s50_s10 = scalar_lea.hbm %s100_s0, 128  ;;  %s14_s7 = int_to_ptr.vmem [resolvable:$true] %s13_s7 }
   0x2   :  { %p51_p0 = scmp.ne.s32.totalorder %s100_s0, %s50_s10  ;;  %p54_p1 = scmp.lt.u32.totalorder %s50_s10, %s100_s0 }
   0x4   :  { %p56_p2 = pnand %p54_p1, %p51_p0 }
   0x6   :  { %59 = shalt.err (!%p56_p2)
}
   0x7   :  { %s60_s15 = scalar_lea.vmem %s14_s7, 128  ;;  %p65_p4 = scmp.lt.s32.totalorder %s14_s7, %s14_s7 }
   0x8   :  { %p61_p3 = scmp.ne.s32.totalorder %s14_s7, %s60_s15  ;;  %p66_p5 = scmp.lt.s32.totalorder %s60_s15, %s60_s15 }
   0xa   :  { %p67_p6 = por %p66_p5, %p65_p4 }
   0xc   :  { %p68_p7 = pnand %p67_p6, %p61_p3 }
   0xe   :  { %71 = shalt.err (!%p68_p7)
}
   0xf   :  { %16 = dma.hbm_to_vmem [thread:$0]  %s100_s0, 128, %s14_s7, [#allocation4]  }
  0x10   :  { %72 = dma.done.wait [#allocation4], 128  }
  0x11   :  { %73 = vsyncadd [#allocation4], 4294967168  ;;  %v26_v0 = vlaneseq  ;;  %v25_v2 = vld [vmem:[#allocation3] sm:$0xff]  ;;  %vm42_vm1 = vcmask 7168  }
  0x13   :  { %v27_v1 = vand.u32 127, %v26_v0 }
  0x15   :  { %vm31_vm0 = vcmp.lt.s32.totalorder %v27_v1, 16 }
  0x16   :  { %v32_v3 = vsel %vm31_vm0, %v25_v2, -inf }
  0x17   :  { %40 = vmax.xlane.f32.xlu0 %v32_v3 }
  0xa4   :  { %v41_v4 = vpop.xlane.xlu0 %40 }
  0xa5   :  { %43 = vst.msk [vmem:[%s101_s1] sm:$0xff] %vm42_vm1, %v41_v4 }
  0xa6   :  { %48 = vsyncpa [#allocation4], 1 }

</bundles_post_ra>
